<compile_context>
chip_gen: v7x
topology: tpu7x:2x2x1
jax: 0.10.0
libtpu: 0.0.40
codegen_flags: <defaults>
</compile_context>

<pallas_src>
import functools

import jax
import jax.numpy as jnp
from jax.experimental import pallas as pl
from jax.experimental.pallas import tpu as pltpu

EPS = 1e-5
CARDINALITY = 32
TM_MAX = 512                      # max output rows per tile
VMEM_LIMIT = 64 * 1024 * 1024


def _round_up(x, m):
    return ((x + m - 1) // m) * m


def _pick_kc(cinp):
    for cand in (512, 256, 128):
        if cinp % cand == 0:
            return cand
    return cinp


@jax.tree_util.register_pytree_node_class
class ConvP:
    """Folded conv+BN params: arrays are pytree children, layout meta is static aux."""

    def __init__(self, w, b, kind, k, stride, cinp, cout, cpad=0):
        self.w, self.b = w, b
        self.kind, self.k, self.stride = kind, k, stride
        self.cinp, self.cout, self.cpad = cinp, cout, cpad

    def tree_flatten(self):
        return (self.w, self.b), (self.kind, self.k, self.stride,
                                  self.cinp, self.cout, self.cpad)

    @classmethod
    def tree_unflatten(cls, aux, children):
        return cls(*children, *aux)


# --------------------- activation layout (conv as shifted matmuls) ---------------------

def _build_rows(x, k, stride, c_pad=None, pad_value=0.0):
    """Row-flatten (and phase-decompose for stride>1) the padded NHWC input.

    Returns X:(R, Cp) in x.dtype such that the value needed by output pixel
    (n, ho, wo) at conv tap (di, dj) lives at row
        n*Hph*Wph + ho*Wph + wo + offsets[di*k + dj].
    Valid outputs are rows with ho < Ho and wo < Wo; the rest are discarded.
    """
    N, H, W, C = x.shape
    s, p = stride, k // 2
    Ho = (H + 2 * p - k) // s + 1
    Wo = (W + 2 * p - k) // s + 1
    a_max = (k - 1) // s
    Hph, Wph = Ho + a_max, Wo + a_max
    xp = jnp.pad(x, ((0, 0), (p, s * Hph - H - p), (p, s * Wph - W - p), (0, 0)),
                 constant_values=pad_value)
    if c_pad is not None and c_pad > C:
        xp = jnp.pad(xp, ((0, 0), (0, 0), (0, 0), (0, c_pad - C)),
                     constant_values=0.0)
    Cp = xp.shape[-1]
    NHW = N * Hph * Wph
    slabs = [xp[:, pi::s, pj::s, :].reshape(NHW, Cp)
             for pi in range(s) for pj in range(s)]
    X = slabs[0] if s == 1 else jnp.concatenate(slabs, axis=0)
    offsets = tuple(((di % s) * s + (dj % s)) * NHW + (di // s) * Wph + (dj // s)
                    for di in range(k) for dj in range(k))
    M = NHW
    tm = min(TM_MAX, _round_up(M, 8))
    Mp = _round_up(M, tm)
    R = _round_up(Mp + max(offsets) + 8, 8)
    X = jnp.pad(X, ((0, R - X.shape[0]), (0, 0)), constant_values=pad_value)
    return X, offsets, (M, Mp, tm, N, Ho, Wo, Hph, Wph)


# ----------------------------- Pallas kernels -----------------------------

def _conv_kernel(x_ref, w_ref, b_ref, *rest, offsets, tm, grouped, relu, has_res):
    """Conv (sum of shifted matmuls over taps) + bias (+residual) (+ReLU).

    Grid is (cout-chunk, M-tile): weights / grouped channel slices are
    loop-invariant along the inner (fast) M axis. Accumulation is in a local
    f32 value; the output tile is written exactly once (no VMEM scratch RMW).
    """
    if has_res:
        res_ref, o_ref = rest
    else:
        (o_ref,) = rest
    base = pl.multiple_of(pl.program_id(1) * tm, tm)
    acc = jnp.zeros(o_ref.shape, jnp.float32)
    if grouped:
        # x_ref: (R, 128) channel chunk selected by BlockSpec; w_ref: (T,1,128,128)
        for t, off in enumerate(offsets):
            a = x_ref[pl.ds(base + off, tm), :]
            acc = acc + jnp.dot(a, w_ref[t, 0],
                                preferred_element_type=jnp.float32)
    else:
        # x_ref: (R, Cinp) resident slab; w_ref: (T*nk, kc, tn)
        kc = w_ref.shape[1]
        nk = w_ref.shape[0] // len(offsets)
        for t, off in enumerate(offsets):
            for q in range(nk):
                a = x_ref[pl.ds(base + off, tm), pl.ds(q * kc, kc)]
                acc = acc + jnp.dot(a, w_ref[t * nk + q],
                                    preferred_element_type=jnp.float32)
    r = acc + b_ref[...]
    if has_res:
        r = r + res_ref[...].astype(jnp.float32)
    if relu:
        r = jnp.maximum(r, 0.0)
    o_ref[...] = r.astype(o_ref.dtype)


def _maxpool_kernel(x_ref, o_ref, *, offsets, tm):
    base = pl.multiple_of(pl.program_id(0) * tm, tm)
    r = x_ref[pl.ds(base + offsets[0], tm), :]
    for off in offsets[1:]:
        r = jnp.maximum(r, x_ref[pl.ds(base + off, tm), :])
    o_ref[...] = r.astype(o_ref.dtype)


def _gap_kernel(x_ref, o_ref):
    o_ref[...] = jnp.mean(x_ref[...].astype(jnp.float32), axis=1, keepdims=True)


# ----------------------------- op wrappers -----------------------------

def conv2d(x, p, relu=True, residual=None, keep_cout_pad=False,
           out_dtype=jnp.bfloat16):
    """Conv (+folded BN bias) (+residual) (+ReLU) on NHWC input."""
    k, stride = p.k, p.stride
    x = x.astype(jnp.bfloat16)
    if k == 1 and stride > 1:
        x = x[:, ::stride, ::stride, :]
        stride = 1
    grouped = p.kind == "grouped"
    if residual is not None:
        assert k == 1, "residual fusion only used on 1x1 convs"

    if p.kind == "packk":
        # Stem path: pack taps into the contraction dim so the conv becomes a
        # single dense matmul (real K = k*k*cpad) instead of k*k mostly-zero-K ones.
        X, offsets, (M, Mp, tm, N, Ho, Wo, Hph, Wph) = _build_rows(
            x, k, stride, c_pad=p.cpad, pad_value=0.0)
        X = jnp.concatenate([X[off:off + Mp] for off in offsets], axis=1)
        X = jnp.pad(X, ((0, 0), (0, p.cinp - X.shape[1])))
        offsets = (0,)
    else:
        X, offsets, (M, Mp, tm, N, Ho, Wo, Hph, Wph) = _build_rows(
            x, k, stride, c_pad=p.cinp, pad_value=0.0)

    coutp = p.b.shape[1]
    tn = 128 if grouped else min(256, coutp)
    grid = (coutp // tn, Mp // tm)          # cout chunks outer, M tiles inner

    if grouped:
        x_spec = pl.BlockSpec((X.shape[0], 128), lambda n, m: (0, n))
        w_spec = pl.BlockSpec((p.w.shape[0], 1, 128, 128),
                              lambda n, m: (0, n, 0, 0))
    else:
        x_spec = pl.BlockSpec(X.shape, lambda n, m: (0, 0))
        w_spec = pl.BlockSpec((p.w.shape[0], p.w.shape[1], tn),
                              lambda n, m: (0, 0, n))
    in_specs = [x_spec, w_spec, pl.BlockSpec((1, tn), lambda n, m: (0, n))]
    args = [X, p.w, p.b]

    has_res = residual is not None
    if has_res:
        res = residual.reshape(-1, residual.shape[-1]).astype(jnp.bfloat16)
        res = jnp.pad(res, ((0, Mp - res.shape[0]), (0, coutp - res.shape[1])))
        in_specs.append(pl.BlockSpec((tm, tn), lambda n, m: (m, n)))
        args.append(res)

    out = pl.pallas_call(
        functools.partial(_conv_kernel, offsets=offsets, tm=tm,
                          grouped=grouped, relu=relu, has_res=has_res),
        out_shape=jax.ShapeDtypeStruct((Mp, coutp), out_dtype),
        grid_spec=pltpu.PrefetchScalarGridSpec(
            num_scalar_prefetch=0, grid=grid,
            in_specs=in_specs,
            out_specs=pl.BlockSpec((tm, tn), lambda n, m: (m, n))),
        compiler_params=pltpu.CompilerParams(
            dimension_semantics=("parallel", "parallel"),
            vmem_limit_bytes=VMEM_LIMIT),
    )(*args)
    ncout = coutp if keep_cout_pad else p.cout
    out = out[:M, :ncout].reshape(N, Hph, Wph, ncout)[:, :Ho, :Wo, :]
    return out


def max_pool_3x3_s2_p1(x):
    """nn.MaxPool2d(kernel_size=3, stride=2, padding=1) on NHWC input (bf16)."""
    N, H, W, C = x.shape
    X, offsets, (M, Mp, tm, _, Ho, Wo, Hph, Wph) = _build_rows(
        x.astype(jnp.bfloat16), 3, 2, c_pad=None, pad_value=float("-inf"))
    out = pl.pallas_call(
        functools.partial(_maxpool_kernel, offsets=offsets, tm=tm),
        out_shape=jax.ShapeDtypeStruct((Mp, C), jnp.bfloat16),
        grid_spec=pltpu.PrefetchScalarGridSpec(
            num_scalar_prefetch=0, grid=(Mp // tm,),
            in_specs=[pl.BlockSpec(X.shape, lambda m: (0, 0))],
            out_specs=pl.BlockSpec((tm, C), lambda m: (m, 0))),
        compiler_params=pltpu.CompilerParams(
            dimension_semantics=("parallel",),
            vmem_limit_bytes=VMEM_LIMIT),
    )(X)
    return out[:M].reshape(N, Hph, Wph, C)[:, :Ho, :Wo, :]


def global_avg_pool(x):
    """nn.AdaptiveAvgPool2d(1) on NHWC input -> (N, C) float32."""
    N, H, W, C = x.shape
    xf = x.reshape(N, H * W, C)
    out = pl.pallas_call(
        _gap_kernel,
        out_shape=jax.ShapeDtypeStruct((N, 1, C), jnp.float32),
        grid_spec=pltpu.PrefetchScalarGridSpec(
            num_scalar_prefetch=0, grid=(N,),
            in_specs=[pl.BlockSpec((1, H * W, C), lambda n: (n, 0, 0))],
            out_specs=pl.BlockSpec((1, 1, C), lambda n: (n, 0, 0))),
        compiler_params=pltpu.CompilerParams(
            dimension_semantics=("parallel",),
            vmem_limit_bytes=VMEM_LIMIT),
    )(xf)
    return out.reshape(N, C)


# ----------------------------- weight preparation -----------------------------

def _fold_bn(w, gamma, beta, mean, var):
    scale = gamma / jnp.sqrt(var + EPS)
    return w * scale[:, None, None, None], beta - mean * scale


def _prep_dense(w, bias, stride=1):
    """PyTorch (Cout, Cin, k, k) -> tap-major, K-chunked bf16 weight."""
    cout, cin, k, _ = w.shape
    T = k * k
    cinp, coutp = _round_up(cin, 128), _round_up(cout, 128)
    wt = jnp.transpose(w, (2, 3, 1, 0)).reshape(T, cin, cout)
    wt = jnp.pad(wt, ((0, 0), (0, cinp - cin), (0, coutp - cout)))
    kc = _pick_kc(cinp)
    wt = wt.reshape(T * (cinp // kc), kc, coutp).astype(jnp.bfloat16)
    b = jnp.pad(bias, (0, coutp - cout)).astype(jnp.float32).reshape(1, coutp)
    return ConvP(wt, b, "dense", k, stride, cinp, cout)


def _prep_packk(w, bias, stride=1):
    """Small-cin conv (stem): pack the k*k taps into the contraction dim."""
    cout, cin, k, _ = w.shape
    T = k * k
    cpad = _round_up(cin, 4)
    coutp = _round_up(cout, 128)
    wt = jnp.transpose(w, (2, 3, 1, 0))                       # (k,k,cin,cout)
    wt = jnp.pad(wt, ((0, 0), (0, 0), (0, cpad - cin), (0, coutp - cout)))
    wt = wt.reshape(T * cpad, coutp)
    kp = _round_up(T * cpad, 128)
    wt = jnp.pad(wt, ((0, kp - T * cpad), (0, 0)))
    kc = _pick_kc(kp)
    wt = wt.reshape(kp // kc, kc, coutp).astype(jnp.bfloat16)
    b = jnp.pad(bias, (0, coutp - cout)).astype(jnp.float32).reshape(1, coutp)
    return ConvP(wt, b, "packk", k, stride, kp, cout, cpad=cpad)


def _prep_grouped(w, bias, groups, stride=1):
    """Grouped (Cout, Cg, k, k) -> lane-dense 128x128 block-diagonal chunks."""
    cout, cg, k, _ = w.shape
    G = groups
    ng = cout // G
    assert cg == ng and 128 % ng == 0 and cout % 128 == 0
    T = k * k
    gc = 128 // ng            # groups packed per 128-wide chunk
    nq = G // gc              # number of 128x128 chunks (= cout // 128)
    wt = jnp.transpose(w.reshape(G, ng, cg, k, k), (3, 4, 0, 2, 1))  # (k,k,G,cg,ng)
    wt = wt.reshape(T, nq, gc, cg, ng)
    wt = jnp.einsum("tqrcn,rs->tqrcsn", wt, jnp.eye(gc, dtype=wt.dtype))
    wt = wt.reshape(T, nq, 128, 128).astype(jnp.bfloat16)
    b = bias.astype(jnp.float32).reshape(1, cout)
    return ConvP(wt, b, "grouped", k, stride, G * cg, cout)


class _ParamGen:
    def __init__(self, key):
        self.key = key

    def next(self):
        self.key, sub = jax.random.split(self.key)
        return sub


def make_conv_bn(pg, cin, cout, k, groups=1, stride=1, pack_k=False):
    fan_in = (cin // groups) * k * k
    w = jax.random.normal(pg.next(), (cout, cin // groups, k, k),
                          jnp.float32) * (2.0 / fan_in) ** 0.5
    gamma = jax.random.uniform(pg.next(), (cout,), jnp.float32, 0.8, 1.2)
    beta = jax.random.normal(pg.next(), (cout,), jnp.float32) * 0.05
    mean = jax.random.normal(pg.next(), (cout,), jnp.float32) * 0.05
    var = jax.random.uniform(pg.next(), (cout,), jnp.float32, 0.8, 1.2)
    wf, bf = _fold_bn(w, gamma, beta, mean, var)
    if groups > 1:
        return _prep_grouped(wf, bf, groups, stride)
    if pack_k:
        return _prep_packk(wf, bf, stride)
    return _prep_dense(wf, bf, stride)


def make_block_params(pg, cin, cout, k, stride):
    mid = cout // 2
    p = {"conv1": make_conv_bn(pg, cin, mid, 1),
         "conv2": make_conv_bn(pg, mid, mid, k, groups=CARDINALITY, stride=stride),
         "conv3": make_conv_bn(pg, mid, cout, 1)}
    if cin != cout or stride != 1:
        p["proj"] = make_conv_bn(pg, cin, cout, 1, stride=stride)
    return p


def make_resnext50_params(key, in_channels, classes):
    pg = _ParamGen(key)
    params = {"stem": make_conv_bn(pg, in_channels, 64, 7, stride=2, pack_k=True)}
    cfgs = [([128, 3, 256, 1, 3], 64),
            ([256, 3, 512, 2, 4], 256),
            ([512, 3, 1024, 2, 6], 512),
            ([1024, 3, 2048, 2, 3], 1024)]
    layers = []
    for cfg, pre_ch in cfgs:
        _, k, cout, stride, n_blocks = cfg
        cin = pre_ch
        blocks = []
        for i in range(n_blocks):
            s = stride if i == 0 else 1
            blocks.append(make_block_params(pg, cin, cout, k, s))
            cin = cout
        layers.append(blocks)
    params["layers"] = layers
    params["cls_conv"] = make_conv_bn(pg, 2048, 1280, 1)
    wf = jax.random.normal(pg.next(), (classes, 1280, 1, 1),
                           jnp.float32) * (1.0 / 1280.0) ** 0.5
    bf = jax.random.normal(pg.next(), (classes,), jnp.float32) * 0.01
    params["cls_final"] = _prep_dense(wf, bf)
    return params


# ----------------------------- forward pass -----------------------------

def resnext_block(x, p):
    out = conv2d(x, p["conv1"], relu=True)
    out = conv2d(out, p["conv2"], relu=True)
    if "proj" in p:
        identity = conv2d(x, p["proj"], relu=False)
    else:
        identity = x
    # conv3 + BN + residual add + ReLU fused into one kernel epilogue.
    return conv2d(out, p["conv3"], relu=True, residual=identity)


def resnext50_forward(params, x_nchw):
    x = jnp.transpose(x_nchw, (0, 2, 3, 1)).astype(jnp.bfloat16)   # NCHW -> NHWC
    # Keep the stem output channel-padded to 128 through the maxpool: the pool
    # stores lane-dense tiles and the next convs' weight rows for the pad lanes
    # are zero, so no crop/re-pad is needed.
    x = conv2d(x, params["stem"], relu=True, keep_cout_pad=True)
    x = max_pool_3x3_s2_p1(x)
    for blocks in params["layers"]:
        for bp in blocks:
            x = resnext_block(x, bp)
    x = conv2d(x, params["cls_conv"], relu=True)
    pooled = global_avg_pool(x)                                    # (N, 1280)
    pred = conv2d(pooled.reshape(pooled.shape[0], 1, 1, -1),
                  params["cls_final"], relu=False)                 # (N,1,1,cls)
    pred = pred.reshape(pred.shape[0], -1).astype(jnp.float32)
    return {"pred": pred}


resnext50_forward_jit = jax.jit(resnext50_forward)


# ----------------------------- self checks (pure-JAX reference) -----------------------------

def _conv_ref(x, w, b, stride, groups, relu, residual=None):
    k = w.shape[-1]
    xr = x.astype(jnp.bfloat16).astype(jnp.float32)
    wr = jnp.transpose(w, (2, 3, 1, 0)).astype(jnp.bfloat16).astype(jnp.float32)
    y = jax.lax.conv_general_dilated(
        xr, wr, (stride, stride), [(k // 2, k // 2)] * 2,
        dimension_numbers=("NHWC", "HWIO", "NHWC"),
        feature_group_count=groups,
        precision=jax.lax.Precision.HIGHEST) + b
    if residual is not None:
        y = y + residual.astype(jnp.float32)
    if relu:
        y = jnp.maximum(y, 0.0)
    return y


def _assert_close(got, want, name, tol=2e-2):
    got = jnp.asarray(got, jnp.float32)
    want = jnp.asarray(want, jnp.float32)
    err = float(jnp.max(jnp.abs(got - want)) /
                jnp.maximum(jnp.max(jnp.abs(want)), 1e-3))
    assert err < tol, f"{name}: relative error {err:.4f}"


def _run_self_checks():
    key = jax.random.PRNGKey(1)
    cfgs = [
        ("stem7x7s2_packK", 3, 64, 7, 2, 1, True, False, 11),
        ("grp3x3s1", 128, 128, 3, 1, CARDINALITY, True, False, 8),
        ("grp3x3s2", 256, 256, 3, 2, CARDINALITY, True, False, 7),
        ("1x1res", 64, 256, 1, 1, 1, True, True, 5),
    ]
    for name, cin, cout, k, s, g, relu, with_res, hw in cfgs:
        key, kx, kw, kb, kr = jax.random.split(key, 5)
        x = jax.random.normal(kx, (2, hw, hw, cin), jnp.float32)
        w = jax.random.normal(kw, (cout, cin // g, k, k), jnp.float32) * 0.1
        b = jax.random.normal(kb, (cout,), jnp.float32) * 0.1
        if g > 1:
            p = _prep_grouped(w, b, g, stride=s)
        elif cin <= 8 and k > 1:
            p = _prep_packk(w, b, stride=s)
        else:
            p = _prep_dense(w, b, stride=s)
        res = None
        if with_res:
            ho = (hw + 2 * (k // 2) - k) // s + 1
            res = jax.random.normal(kr, (2, ho, ho, cout),
                                    jnp.float32).astype(jnp.bfloat16)
        got = conv2d(x.astype(jnp.bfloat16), p, relu=relu, residual=res)
        want = _conv_ref(x, w, b, s, g, relu, residual=res)
        _assert_close(got, want, name)
    key, kx = jax.random.split(key)
    x = jax.random.normal(kx, (2, 7, 7, 64), jnp.float32).astype(jnp.bfloat16)
    got = max_pool_3x3_s2_p1(x)
    want = jax.lax.reduce_window(
        x.astype(jnp.float32), -jnp.inf, jax.lax.max,
        (1, 3, 3, 1), (1, 2, 2, 1), [(0, 0), (1, 1), (1, 1), (0, 0)])
    _assert_close(got, want, "maxpool")


if __name__ == "__main__":
    _run_self_checks()
    key = jax.random.PRNGKey(0)
    pkey, xkey = jax.random.split(key)
    in_channels, classes = 3, 10
    params = make_resnext50_params(pkey, in_channels, classes)
    x = jax.random.normal(xkey, (2, in_channels, 32, 32), jnp.float32)
    out = resnext50_forward_jit(params, x)
    pred = jax.block_until_ready(out["pred"])
    assert pred.shape == (2, classes), pred.shape
    assert bool(jnp.all(jnp.isfinite(pred)))
    print("KERNEL_OK")
</pallas_src>

<mosaic_0001>
module attributes {stable_mosaic.version = 11 : i64} {
  func.func @_conv_kernel(%arg0: i32, %arg1: i32, %arg2: memref<168x256xbf16, #tpu.memory_space<vmem>>, %arg3: memref<1x256x128xbf16, #tpu.memory_space<vmem>>, %arg4: memref<1x128xf32, #tpu.memory_space<vmem>>, %arg5: memref<168x128xbf16, #tpu.memory_space<vmem>>) attributes {dimension_semantics = [#tpu.dimension_semantics<parallel>, #tpu.dimension_semantics<parallel>], iteration_bounds = array<i64: 1, 1>, scalar_prefetch = 0 : i64, scratch_operands = 0 : i64, tpu.core_type = #tpu.core_type<tc>, window_params = [{pipeline_mode = #tpu.pipeline_mode<synchronous>, transform_indices = @transform_0, window_bounds = array<i64: 168, 256>}, {transform_indices = @transform_1, window_bounds = array<i64: 1, 256, 128>}, {transform_indices = @transform_2, window_bounds = array<i64: 1, 128>}, {transform_indices = @transform_3, window_bounds = array<i64: 168, 128>}]} {
    %c168_i32 = arith.constant 168 : i32
    %0 = arith.muli %arg1, %c168_i32 : i32
    %1 = tpu.assume_multiple %0, 168 : i32
    %cst = arith.constant 0.000000e+00 : f32
    %2 = vector.broadcast %cst : f32 to vector<168x128xf32>
    %c0_i32 = arith.constant 0 : i32
    %3 = arith.addi %1, %c0_i32 : i32
    %4 = arith.index_cast %3 : i32 to index
    %c0 = arith.constant 0 : index
    %5 = vector.load %arg2[%4, %c0] : memref<168x256xbf16, #tpu.memory_space<vmem>>, vector<168x256xbf16>
    %c0_0 = arith.constant 0 : index
    %c0_1 = arith.constant 0 : index
    %c0_2 = arith.constant 0 : index
    %6 = vector.load %arg3[%c0_0, %c0_1, %c0_2] : memref<1x256x128xbf16, #tpu.memory_space<vmem>>, vector<1x256x128xbf16>
    %7 = vector.shape_cast %6 : vector<1x256x128xbf16> to vector<256x128xbf16>
    %cst_3 = arith.constant dense<0.000000e+00> : vector<168x128xf32>
    %8 = tpu.matmul %5, %7, %cst_3 {dimension_numbers = #tpu.dot_dimension_numbers<[1], [0], [0], [1], [0, 0, 1, 1], [], []>} : vector<168x256xbf16>, vector<256x128xbf16>, vector<168x128xf32> -> vector<168x128xf32>
    %9 = arith.addf %2, %8 : vector<168x128xf32>
    %c0_4 = arith.constant 0 : index
    %c0_5 = arith.constant 0 : index
    %10 = vector.load %arg4[%c0_4, %c0_5] : memref<1x128xf32, #tpu.memory_space<vmem>>, vector<1x128xf32>
    %11 = vector.broadcast %10 : vector<1x128xf32> to vector<168x128xf32>
    %12 = arith.addf %9, %11 : vector<168x128xf32>
    %cst_6 = arith.constant 0.000000e+00 : f32
    %13 = vector.broadcast %cst_6 : f32 to vector<168x128xf32>
    %14 = arith.maximumf %12, %13 : vector<168x128xf32>
    %15 = arith.truncf %14 : vector<168x128xf32> to vector<168x128xbf16>
    %c0_7 = arith.constant 0 : index
    %c0_8 = arith.constant 0 : index
    %16 = vector.load %arg5[%c0_7, %c0_8] : memref<168x128xbf16, #tpu.memory_space<vmem>>, vector<168x128xbf16>
    tpu.vector_store %arg5[%c0_7, %c0_8], %15 {strides = array<i32>} : memref<168x128xbf16, #tpu.memory_space<vmem>>, vector<168x128xbf16>,
    return
  }
  func.func @transform_0(%arg0: i32, %arg1: i32) -> (i32, i32) {
    %c0_i32 = arith.constant 0 : i32
    %c0_i32_0 = arith.constant 0 : i32
    %c0_i32_1 = arith.constant 0 : i32
    return %c0_i32, %c0_i32_0 : i32, i32
  }
  func.func @transform_1(%arg0: i32, %arg1: i32) -> (i32, i32, i32) {
    %c0_i32 = arith.constant 0 : i32
    %c0_i32_0 = arith.constant 0 : i32
    %c0_i32_1 = arith.constant 0 : i32
    return %c0_i32, %c0_i32_0, %arg0 : i32, i32, i32
  }
  func.func @transform_2(%arg0: i32, %arg1: i32) -> (i32, i32) {
    %c0_i32 = arith.constant 0 : i32
    %c0_i32_0 = arith.constant 0 : i32
    return %c0_i32, %arg0 : i32, i32
  }
  func.func @transform_3(%arg0: i32, %arg1: i32) -> (i32, i32) {
    %c0_i32 = arith.constant 0 : i32
    return %arg1, %arg0 : i32, i32
  }
}

</mosaic_0001>

<bundles_post_ra>
// kernel: tpu_custom_call.1
= control target key start
LH: loop header
LB: loop body
LE: loop exit
PB: predicated region body
PF: predicated region fallthrough
CT: control target
= control target key end

     0   :  { %8 = vsyncpa [#allocation3], 0  ;;  %s1084_s0 = inlined_call_operand.hbm [shape: bf16[168,256], index: 0, kind: input, shape index: {}]   ;;  %s1085_s1 = inlined_call_operand.hbm [shape: bf16[1,256,128], index: 1, kind: input, shape index: {}]   ;;  %s1086_s2 = inlined_call_operand.hbm [shape: f32[1,128], index: 2, kind: input, shape index: {}]   ;;  %s1087_s3 = inlined_call_operand.hbm [shape: bf16[168,128], index: 3, kind: output, shape index: {}]  }
   0x1   :  { %9 = vsyncpa [#allocation6], 0 }
   0x2   :  { %10 = vsyncpa [#allocation4], 0  ;;  %s979_s12 = smov [#allocation5]   ;;  %s885_s16 = scalar_lea.hbm %s1085_s1, 2048 }
   0x3   :  { %s28_s13 = sshll.u32 %s979_s12, 4  ;;  %p886_p0 = scmp.ne.s32.totalorder %s1085_s1, %s885_s16  ;;  %s29_s13 = int_to_ptr.vmem [resolvable:$true] %s28_s13 }
   0x4   :  { %p889_p1 = scmp.lt.u32.totalorder %s885_s16, %s1085_s1 }
   0x6   :  { %p891_p2 = pnand %p889_p1, %p886_p0 }
   0x8   :  { %894 = shalt.err (!%p891_p2)
}
   0x9   :  { %s895_s21 = scalar_lea.vmem %s29_s13, 2048  ;;  %p900_p4 = scmp.lt.s32.totalorder %s29_s13, %s29_s13 }
   0xa   :  { %p896_p3 = scmp.ne.s32.totalorder %s29_s13, %s895_s21  ;;  %p901_p5 = scmp.lt.s32.totalorder %s895_s21, %s895_s21 }
   0xc   :  { %p902_p6 = por %p901_p5, %p900_p4 }
   0xe   :  { %p903_p7 = pnand %p902_p6, %p896_p3 }
  0x10   :  { %906 = shalt.err (!%p903_p7)
}
  0x11   :  { %s980_s22 = smov 64   ;;  %s981_s23 = smov 4  }
  0x12   :  { %34 = dma.hbm_to_vmem [thread:$0]  %s1085_s1, 2048, %s29_s13, [#allocation6], %s980_s22, %s980_s22, %s981_s23  }
  0x13   :  { %s982_s26 = smov [#allocation2]   ;;  %s907_s30 = scalar_lea.hbm %s1084_s0, 2688 }
  0x14   :  { %s16_s27 = sshll.u32 %s982_s26, 4  ;;  %p908_p8 = scmp.ne.s32.totalorder %s1084_s0, %s907_s30  ;;  %s17_s27 = int_to_ptr.vmem [resolvable:$true] %s16_s27 }
  0x15   :  { %p911_p9 = scmp.lt.u32.totalorder %s907_s30, %s1084_s0 }
  0x17   :  { %p913_p10 = pnand %p911_p9, %p908_p8 }
  0x19   :  { %916 = shalt.err (!%p913_p10)
}
  0x1a   :  { %s917_s8 = scalar_lea.vmem %s17_s27, 2688  ;;  %p922_p12 = scmp.lt.s32.totalorder %s17_s27, %s17_s27 }
  0x1b   :  { %p918_p11 = scmp.ne.s32.totalorder %s17_s27, %s917_s8  ;;  %p923_p13 = scmp.lt.s32.totalorder %s917_s8, %s917_s8 }
  0x1d   :  { %p924_p0 = por %p923_p13, %p922_p12 }
  0x1f   :  { %p925_p1 = pnand %p924_p0, %p918_p11 }
  0x21   :  { %928 = shalt.err (!%p925_p1)
}
  0x22   :  { %s983_s1 = smov 128   ;;  %s984_s9 = smov 8  }
  0x23   :  { %22 = dma.hbm_to_vmem [thread:$0]  %s1084_s0, 2688, %s17_s27, [#allocation3], %s983_s1, %s983_s1, %s984_s9  }
  0x24   :  { %s985_s12 = smov [#allocation7]   ;;  %s929_s16 = scalar_lea.hbm %s1086_s2, 16 }
  0x25   :  { %s41_s13 = sshll.u32 %s985_s12, 4  ;;  %p930_p2 = scmp.ne.s32.totalorder %s1086_s2, %s929_s16  ;;  %s42_s13 = int_to_ptr.vmem [resolvable:$true] %s41_s13 }
  0x26   :  { %p933_p3 = scmp.lt.u32.totalorder %s929_s16, %s1086_s2 }
  0x28   :  { %p935_p4 = pnand %p933_p3, %p930_p2 }
  0x2a   :  { %938 = shalt.err (!%p935_p4)
}
  0x2b   :  { %s939_s21 = scalar_lea.vmem %s42_s13, 16  ;;  %s943_s0 = scalar_lea.vmem %s42_s13, 32 }
  0x2c   :  { %p940_p5 = scmp.ne.s32.totalorder %s42_s13, %s939_s21  ;;  %p944_p6 = scmp.lt.s32.totalorder %s42_s13, %s42_s13 }
  0x2d   :  { %p945_p7 = scmp.lt.s32.totalorder %s943_s0, %s939_s21 }
  0x2f   :  { %p946_p8 = por %p945_p7, %p944_p6 }
  0x31   :  { %p947_p9 = pnand %p946_p8, %p940_p5 }
  0x33   :  { %950 = shalt.err (!%p947_p9)
}
  0x34   :  { %44 = dma.hbm_to_vmem [thread:$0]  %s1086_s2, 16, %s42_s13, [#allocation6]  }
  0x35   :  { %973 = dma.done.wait [#allocation3], 2688  }
  0x36   :  { %974 = vsyncadd [#allocation3], 4294964608 }
  0x37   :  { %975 = dma.done.wait [#allocation6], 2064  }
  0x38   :  { %976 = vsyncadd [#allocation6], 4294965232  ;;  %v837_v0 = vld [vmem:[#allocation5 + $0x40] sm:$0xff]   ;;  %v839_v2 = vld [vmem:[#allocation5 + $0x48] sm:$0xff]   ;;  %s986_s2 = smov [#allocation8]  }
  0x39   :  { %v838_v1 = vld [vmem:[#allocation5] sm:$0xff]   ;;  %731 = vmatprep.subr.bf16.mxu0 %v837_v0  ;;  %813 = vmatprep.subr.bf16.mxu1 %v837_v0  ;;  %v840_v3 = vld [vmem:[#allocation5 + $0x8] sm:$0xff]   ;;  %v841_v4 = vld [vmem:[#allocation5 + $0x50] sm:$0xff]   ;;  %s576_s26 = sshll.u32 %s986_s2, 4  ;;  %s577_s26 = int_to_ptr.vmem [resolvable:$true] %s576_s26 }
  0x3a   :  { %732 = vmatpush3.bf16.msra.mxu0 %v838_v1  ;;  %821 = vmatpush3.bf16.msra.mxu1 %v838_v1  ;;  %v842_v5 = vld [vmem:[#allocation5 + $0x10] sm:$0xff]   ;;  %v843_v6 = vld [vmem:[#allocation5 + $0x58] sm:$0xff]   ;;  %v845_v8 = vld [vmem:[#allocation5 + $0x60] sm:$0xff]   ;;  %s951_s27 = scalar_lea.vmem %s577_s26, 1344  ;;  %p956_p11 = scmp.lt.s32.totalorder %s577_s26, %s577_s26 }
  0x3b   :  { %733 = vmatprep.subr.bf16.mxu0 %v839_v2  ;;  %814 = vmatprep.subr.bf16.mxu1 %v839_v2  ;;  %v844_v7 = vld [vmem:[#allocation5 + $0x18] sm:$0xff]   ;;  %v846_v9 = vld [vmem:[#allocation5 + $0x20] sm:$0xff]   ;;  %v847_v10 = vld [vmem:[#allocation5 + $0x68] sm:$0xff]   ;;  %p952_p10 = scmp.ne.s32.totalorder %s577_s26, %s951_s27  ;;  %p957_p12 = scmp.lt.s32.totalorder %s951_s27, %s951_s27 }
  0x3c   :  { %v855_v11 = vld [vmem:[#allocation2 + $0x4] ss:$8 sps:$4 sm:$0xff]   ;;  %v848_v13 = vld [vmem:[#allocation5 + $0x28] sm:$0xff]   ;;  %v849_v14 = vld [vmem:[#allocation5 + $0x70] sm:$0xff]  }
  0x3d   :  { %v858_v12 = vld [vmem:[#allocation2 + $0x64] ss:$8 sps:$4 sm:$0xff]   ;;  %356 = vmatprep.mubr.bf16.mxu0 %v855_v11  ;;  %v850_v15 = vld [vmem:[#allocation5 + $0x30] sm:$0xff]   ;;  %v853_v18 = vld [vmem:[#allocation2] ss:$8 sps:$4 sm:$0xff]   ;;  %p958_p13 = por %p957_p12, %p956_p11 }
  0x3e   :  { %734 = vmatpush3.bf16.msra.mxu0 %v840_v3  ;;  %822 = vmatpush3.bf16.msra.mxu1 %v840_v3  ;;  %v851_v16 = vld [vmem:[#allocation5 + $0x78] sm:$0xff]   ;;  %v859_v20 = vld [vmem:[#allocation2 + $0x14] ss:$8 sps:$4 sm:$0xff]   ;;  %v861_v22 = vld [vmem:[#allocation2 + $0x10] ss:$8 sps:$4 sm:$0xff]  }
  0x3f   :  { %735 = vmatprep.subr.bf16.mxu0 %v841_v4  ;;  %815 = vmatprep.subr.bf16.mxu1 %v841_v4  ;;  %v852_v17 = vld [vmem:[#allocation5 + $0x38] sm:$0xff]   ;;  %v862_v21 = vld [vmem:[#allocation2 + $0x74] ss:$8 sps:$4 sm:$0xff]   ;;  %v866_v23 = vld [vmem:[#allocation2 + $0x70] ss:$8 sps:$4 sm:$0xff]   ;;  %p959_p0 = pnand %p958_p13, %p952_p10 }
  0x40   :  { %404 = vmatprep.mubr.bf16.mxu1 %v858_v12  ;;  %v856_v19 = vld [vmem:[#allocation2 + $0x60] ss:$8 sps:$4 sm:$0xff]   ;;  %v864_v24 = vld [vmem:[#allocation2 + $0x24] ss:$8 sps:$4 sm:$0xff]   ;;  %v870_v28 = vld [vmem:[#allocation2 + $0x34] ss:$8 sps:$4 sm:$0xff]  }
  0x41   :  { %v868_v25 = vld [vmem:[#allocation2 + $0x84] ss:$8 sps:$4 sm:$0xff]   ;;  %v867_v26 = vld [vmem:[#allocation2 + $0x20] ss:$8 sps:$4 sm:$0xff]   ;;  %v874_v29 = vld [vmem:[#allocation2 + $0x94] ss:$8 sps:$4 sm:$0xff]  }
  0x42   :  { %736 = vmatpush3.bf16.msra.mxu0 %v842_v5  ;;  %823 = vmatpush3.bf16.msra.mxu1 %v842_v5  ;;  %v872_v27 = vld [vmem:[#allocation2 + $0x80] ss:$8 sps:$4 sm:$0xff]   ;;  %v873_v31 = vld [vmem:[#allocation2 + $0x30] ss:$8 sps:$4 sm:$0xff]   ;;  %v876_v33 = vld [vmem:[#allocation2 + $0x44] ss:$8 sps:$4 sm:$0xff]  }
  0x43   :  { %737 = vmatprep.subr.bf16.mxu0 %v843_v6  ;;  %816 = vmatprep.subr.bf16.mxu1 %v843_v6  ;;  %v81_v30 = vld [vmem:[#allocation2 + $0xa0] sm:$0xff]  ;;  %v878_v32 = vld [vmem:[#allocation2 + $0x90] ss:$8 sps:$4 sm:$0xff]   ;;  %v881_v37 = vld [vmem:[#allocation2 + $0x54] ss:$8 sps:$4 sm:$0xff]  }
  0x44   :  { %v613_v34 = vcombine.high %v81_v30, %v81_v30  ;;  %v879_v35 = vld [vmem:[#allocation2 + $0x40] ss:$8 sps:$4 sm:$0xff]   ;;  %v612_v36 = vcombine.low %v81_v30, %v81_v30  ;;  %v884_v38 = vld [vmem:[#allocation2 + $0x50] ss:$8 sps:$4 sm:$0xff]  }
  0x45   :  { %v1046_v41 = vld [vmem:[#allocation7] ss:$0 sm:$0xff] }
  0x46   :  { %738 = vmatpush3.bf16.msra.mxu0 %v844_v7  ;;  %824 = vmatpush3.bf16.msra.mxu1 %v844_v7 }
  0x47   :  { %739 = vmatprep.subr.bf16.mxu0 %v845_v8  ;;  %817 = vmatprep.subr.bf16.mxu1 %v845_v8 }
  0x4a   :  { %740 = vmatpush3.bf16.msra.mxu0 %v846_v9  ;;  %825 = vmatpush3.bf16.msra.mxu1 %v846_v9 }
  0x4b   :  { %741 = vmatprep.subr.bf16.mxu0 %v847_v10  ;;  %818 = vmatprep.subr.bf16.mxu1 %v847_v10 }
  0x4e   :  { %742 = vmatpush3.bf16.msra.mxu0 %v848_v13  ;;  %826 = vmatpush3.bf16.msra.mxu1 %v848_v13 }
  0x4f   :  { %743 = vmatprep.subr.bf16.mxu0 %v849_v14  ;;  %819 = vmatprep.subr.bf16.mxu1 %v849_v14 }
  0x52   :  { %744 = vmatpush3.bf16.msra.mxu0 %v850_v15  ;;  %827 = vmatpush3.bf16.msra.mxu1 %v850_v15 }
  0x53   :  { %745 = vmatprep.subr.bf16.mxu0 %v851_v16  ;;  %820 = vmatprep.subr.bf16.mxu1 %v851_v16 }
  0x56   :  { %746 = vmatpush3.bf16.msra.mxu0 %v852_v17  ;;  %828 = vmatpush3.bf16.msra.mxu1 %v852_v17 }
  0x59   :  { %357 = vmatmul.mubr.bf16.vlgmr.msra.gmra.mrb[0].mxu0 %v853_v18  ;;  %405 = vmatmul.mubr.bf16.vlgmr.msra.gmra.mrb[0].mxu1 %v856_v19 }
  0x5a   :  { %364 = vmatprep.mubr.bf16.mxu0 %v859_v20  ;;  %412 = vmatprep.mubr.bf16.mxu1 %v862_v21 }
  0x61   :  { %365 = vmatmul.mubr.bf16.gmra.mrb[4].mxu0 %v861_v22  ;;  %413 = vmatmul.mubr.bf16.gmra.mrb[4].mxu1 %v866_v23 }
  0x62   :  { %372 = vmatprep.mubr.bf16.mxu0 %v864_v24  ;;  %420 = vmatprep.mubr.bf16.mxu1 %v868_v25 }
  0x69   :  { %373 = vmatmul.mubr.bf16.gmra.mrb[8].mxu0 %v867_v26  ;;  %421 = vmatmul.mubr.bf16.gmra.mrb[8].mxu1 %v872_v27 }
  0x6a   :  { %380 = vmatprep.mubr.bf16.mxu0 %v870_v28  ;;  %428 = vmatprep.mubr.bf16.mxu1 %v874_v29 }
  0x71   :  { %381 = vmatmul.mubr.bf16.gmra.mrb[12].mxu0 %v873_v31  ;;  %429 = vmatmul.mubr.bf16.gmra.mrb[12].mxu1 %v878_v32 }
  0x72   :  { %388 = vmatprep.mubr.bf16.mxu0 %v876_v33  ;;  %436 = vmatprep.mubr.bf16.mxu1 %v613_v34 }
  0x79   :  { %389 = vmatmul.mubr.bf16.gmra.mrb[16].mxu0 %v879_v35  ;;  %437 = vmatmul.mubr.bf16.gmra.mrb[16].mxu1 %v612_v36 }
  0x7a   :  { %396 = vmatprep.mubr.bf16.mxu0 %v881_v37 }
  0x81   :  { %397 = vmatmul.mubr.bf16.gmra.mrb[20].mxu0 %v884_v38 }
 0x12c   :  { %v747_v39 = vpop.f32.mrb[0].mxu0  ;;  %v783_v40 = vpop.f32.mrb[0].mxu1 }
 0x12d   :  { %v748_v42 = vpop.f32.mrb[1].mxu0  ;;  %v784_v43 = vpop.f32.mrb[1].mxu1 }
 0x12e   :  { %v749_v44 = vadd.f32 %v748_v42, %v747_v39  ;;  %v750_v45 = vpop.f32.mrb[2].mxu0  ;;  %v785_v46 = vadd.f32 %v784_v43, %v783_v40  ;;  %v786_v47 = vpop.f32.mrb[2].mxu1 }
 0x12f   :  { %v751_v48 = vpop.f32.mrb[3].mxu0  ;;  %v787_v49 = vpop.f32.mrb[3].mxu1 }
 0x130   :  { %v359_v50 = vadd.f32 %v749_v44, %v1046_v41  ;;  %v752_v51 = vadd.f32 %v751_v48, %v750_v45  ;;  %v407_v52 = vadd.f32 %v785_v46, %v1046_v41  ;;  %v788_v53 = vadd.f32 %v787_v49, %v786_v47 }
 0x132   :  { %v362_v54 = vadd.f32 %v752_v51, %v1046_v41  ;;  %v456_v55 = vmax.f32 %v407_v52, 0.0  ;;  %v410_v56 = vadd.f32 %v788_v53, %v1046_v41  ;;  %v444_v57 = vmax.f32 %v359_v50, 0.0 }
 0x134   :  { %v445_v58 = vmax.f32 %v362_v54, 0.0  ;;  %v753_v59 = vpop.f32.mrb[4].mxu0  ;;  %v457_v60 = vmax.f32 %v410_v56, 0.0  ;;  %v789_v61 = vpop.f32.mrb[4].mxu1 }
 0x135   :  { %v754_v62 = vpop.f32.mrb[5].mxu0  ;;  %v790_v63 = vpop.f32.mrb[5].mxu1 }
 0x136   :  { %v675_v0 = vpack.c.bf16 %v445_v58, %v444_v57  ;;  %v755_v1 = vadd.f32 %v754_v62, %v753_v59  ;;  %v756_v2 = vpop.f32.mrb[6].mxu0  ;;  %v705_v3 = vpack.c.bf16 %v457_v60, %v456_v55  ;;  %v791_v4 = vadd.f32 %v790_v63, %v789_v61  ;;  %v792_v5 = vpop.f32.mrb[6].mxu1 }
 0x137   :  { %v757_v6 = vpop.f32.mrb[7].mxu0  ;;  %v793_v7 = vpop.f32.mrb[7].mxu1 }
 0x138   :  { %676 = vst [vmem:[#allocation8] sm:$0xff] %v675_v0   ;;  %v367_v8 = vadd.f32 %v755_v1, %v1046_v41  ;;  %727 = vst [vmem:[#allocation8 + $0x30] sm:$0xff] %v705_v3   ;;  %v758_v9 = vadd.f32 %v757_v6, %v756_v2  ;;  %v415_v10 = vadd.f32 %v791_v4, %v1046_v41 }
 0x139   :  { %v794_v11 = vadd.f32 %v793_v7, %v792_v5 }
 0x13a   :  { %v370_v12 = vadd.f32 %v758_v9, %v1046_v41  ;;  %v458_v13 = vmax.f32 %v415_v10, 0.0  ;;  %v446_v15 = vmax.f32 %v367_v8, 0.0 }
 0x13b   :  { %v418_v14 = vadd.f32 %v794_v11, %v1046_v41 }
 0x13c   :  { %v447_v16 = vmax.f32 %v370_v12, 0.0  ;;  %v759_v17 = vpop.f32.mrb[8].mxu0  ;;  %v795_v19 = vpop.f32.mrb[8].mxu1 }
 0x13d   :  { %v459_v18 = vmax.f32 %v418_v14, 0.0  ;;  %v760_v20 = vpop.f32.mrb[9].mxu0  ;;  %v796_v21 = vpop.f32.mrb[9].mxu1 }
 0x13e   :  { %v680_v22 = vpack.c.bf16 %v447_v16, %v446_v15  ;;  %v761_v23 = vadd.f32 %v760_v20, %v759_v17  ;;  %v762_v24 = vpop.f32.mrb[10].mxu0  ;;  %v797_v26 = vadd.f32 %v796_v21, %v795_v19  ;;  %v798_v27 = vpop.f32.mrb[10].mxu1 }
 0x13f   :  { %v710_v25 = vpack.c.bf16 %v459_v18, %v458_v13  ;;  %v763_v28 = vpop.f32.mrb[11].mxu0  ;;  %v799_v29 = vpop.f32.mrb[11].mxu1 }
 0x140   :  { %722 = vst [vmem:[#allocation8 + $0x8] sm:$0xff] %v680_v22   ;;  %v375_v30 = vadd.f32 %v761_v23, %v1046_v41  ;;  %v764_v31 = vadd.f32 %v763_v28, %v762_v24  ;;  %v423_v32 = vadd.f32 %v797_v26, %v1046_v41  ;;  %v800_v33 = vadd.f32 %v799_v29, %v798_v27 }
 0x141   :  { %728 = vst [vmem:[#allocation8 + $0x38] sm:$0xff] %v710_v25  }
 0x142   :  { %v378_v34 = vadd.f32 %v764_v31, %v1046_v41  ;;  %v460_v35 = vmax.f32 %v423_v32, 0.0  ;;  %v426_v36 = vadd.f32 %v800_v33, %v1046_v41  ;;  %v448_v37 = vmax.f32 %v375_v30, 0.0 }
 0x144   :  { %v449_v38 = vmax.f32 %v378_v34, 0.0  ;;  %v765_v39 = vpop.f32.mrb[12].mxu0  ;;  %v461_v40 = vmax.f32 %v426_v36, 0.0  ;;  %v801_v42 = vpop.f32.mrb[12].mxu1 }
 0x145   :  { %v766_v43 = vpop.f32.mrb[13].mxu0  ;;  %v802_v44 = vpop.f32.mrb[13].mxu1 }
 0x146   :  { %v685_v45 = vpack.c.bf16 %v449_v38, %v448_v37  ;;  %v767_v46 = vadd.f32 %v766_v43, %v765_v39  ;;  %v768_v47 = vpop.f32.mrb[14].mxu0  ;;  %v715_v48 = vpack.c.bf16 %v461_v40, %v460_v35  ;;  %v803_v49 = vadd.f32 %v802_v44, %v801_v42  ;;  %v804_v50 = vpop.f32.mrb[14].mxu1 }
 0x147   :  { %v769_v51 = vpop.f32.mrb[15].mxu0  ;;  %v805_v52 = vpop.f32.mrb[15].mxu1 }
 0x148   :  { %723 = vst [vmem:[#allocation8 + $0x10] sm:$0xff] %v685_v45   ;;  %v383_v53 = vadd.f32 %v767_v46, %v1046_v41  ;;  %729 = vst [vmem:[#allocation8 + $0x40] sm:$0xff] %v715_v48   ;;  %v770_v54 = vadd.f32 %v769_v51, %v768_v47  ;;  %v431_v55 = vadd.f32 %v803_v49, %v1046_v41 }
 0x149   :  { %v806_v56 = vadd.f32 %v805_v52, %v804_v50 }
 0x14a   :  { %v386_v57 = vadd.f32 %v770_v54, %v1046_v41  ;;  %v462_v58 = vmax.f32 %v431_v55, 0.0  ;;  %v450_v60 = vmax.f32 %v383_v53, 0.0 }
 0x14b   :  { %v434_v59 = vadd.f32 %v806_v56, %v1046_v41 }
 0x14c   :  { %v451_v61 = vmax.f32 %v386_v57, 0.0  ;;  %v771_v62 = vpop.f32.mrb[16].mxu0  ;;  %v807_v0 = vpop.f32.mrb[16].mxu1 }
 0x14d   :  { %v463_v63 = vmax.f32 %v434_v59, 0.0  ;;  %v772_v1 = vpop.f32.mrb[17].mxu0  ;;  %v808_v2 = vpop.f32.mrb[17].mxu1 }
 0x14e   :  { %v690_v3 = vpack.c.bf16 %v451_v61, %v450_v60  ;;  %v773_v4 = vadd.f32 %v772_v1, %v771_v62  ;;  %v774_v5 = vpop.f32.mrb[18].mxu0  ;;  %v809_v7 = vadd.f32 %v808_v2, %v807_v0  ;;  %v810_v8 = vpop.f32.mrb[18].mxu1 }
 0x14f   :  { %v720_v6 = vpack.c.bf16 %v463_v63, %v462_v58  ;;  %v775_v9 = vpop.f32.mrb[19].mxu0  ;;  %v811_v10 = vpop.f32.mrb[19].mxu1 }
 0x150   :  { %724 = vst [vmem:[#allocation8 + $0x18] sm:$0xff] %v690_v3   ;;  %v391_v11 = vadd.f32 %v773_v4, %v1046_v41  ;;  %v776_v12 = vadd.f32 %v775_v9, %v774_v5  ;;  %v439_v13 = vadd.f32 %v809_v7, %v1046_v41 }
 0x151   :  { %730 = vst [vmem:[#allocation8 + $0x48] sm:$0xff] %v720_v6  }
 0x152   :  { %v394_v14 = vadd.f32 %v776_v12, %v1046_v41  ;;  %v464_v15 = vmax.f32 %v439_v13, 0.0  ;;  %v452_v16 = vmax.f32 %v391_v11, 0.0 }
 0x154   :  { %v453_v17 = vmax.f32 %v394_v14, 0.0  ;;  %v777_v18 = vpop.f32.mrb[20].mxu0  ;;  %v671_v19 = vpack.c.bf16 %v464_v15, %v464_v15 }
 0x155   :  { %v778_v20 = vpop.f32.mrb[21].mxu0 }
 0x156   :  { %v695_v21 = vpack.c.bf16 %v453_v17, %v452_v16  ;;  %570 = vst [vmem:[#allocation8 + $0x50] sm:$0xf] %v671_v19  ;;  %v779_v22 = vadd.f32 %v778_v20, %v777_v18  ;;  %v780_v23 = vpop.f32.mrb[22].mxu0 }
 0x157   :  { %v781_v24 = vpop.f32.mrb[23].mxu0 }
 0x158   :  { %725 = vst [vmem:[#allocation8 + $0x20] sm:$0xff] %v695_v21   ;;  %v399_v25 = vadd.f32 %v779_v22, %v1046_v41  ;;  %v782_v26 = vadd.f32 %v781_v24, %v780_v23 }
 0x15a   :  { %v402_v27 = vadd.f32 %v782_v26, %v1046_v41  ;;  %v454_v28 = vmax.f32 %v399_v25, 0.0 }
 0x15c   :  { %v455_v29 = vmax.f32 %v402_v27, 0.0 }
 0x15e   :  { %v700_v30 = vpack.c.bf16 %v455_v29, %v454_v28 }
 0x160   :  { %726 = vst [vmem:[#allocation8 + $0x28] sm:$0xff] %v700_v30  }
 0x161   :  { %962 = shalt.err (!%p959_p0)
}
 0x162   :  { %s963_s30 = scalar_lea.hbm %s1087_s3, 1344 }
 0x163   :  { %p964_p1 = scmp.ne.s32.totalorder %s1087_s3, %s963_s30  ;;  %p967_p2 = scmp.lt.u32.totalorder %s963_s30, %s1087_s3 }
 0x165   :  { %p969_p3 = pnand %p967_p2, %p964_p1 }
 0x167   :  { %972 = shalt.err (!%p969_p3)
}
 0x168   :  { %582 = dma.vmem_to_hbm [thread:$0]  %s577_s26, 1344, %s1087_s3, [#allocation4], %s980_s22, %s980_s22, %s981_s23  }
 0x169   :  { %977 = dma.done.wait [#allocation4], 1344  }
 0x16a   :  { %978 = vsyncadd [#allocation4], 4294965952 }
 0x16b   :  { %586 = vsyncpa [#allocation3], 1 }
 0x16c   :  { %587 = vsyncpa [#allocation6], 1 }
 0x16d   :  { %588 = vsyncpa [#allocation4], 1 }

</bundles_post_ra>
